<compile_context>
chip_gen: v5e
topology: v5e:2x2
jax: 0.10.0
libtpu: 0.0.40
codegen_flags: <defaults>
</compile_context>

<pallas_src>
import functools

import jax
import jax.numpy as jnp
import numpy as np
from jax.experimental import pallas as pl
from jax.experimental.pallas import tpu as pltpu


def _mixed_op_kernel(aw_ref, x_ref, w_ref, gb_ref, m_ref, out_ref, patch_ref,
                     *, W, mxu_dtype):
    # aw_ref  : (3,)        SMEM  architecture weights [skip, conv3x3, closed]
    # x_ref   : (Nb, C, HW) VMEM  Nb samples, channels on sublanes, H*W on lanes
    # w_ref   : (C, 9C)     VMEM  conv weights in MXU dtype, w[c_out, t*C + c_in]
    # gb_ref  : (2, C, 1)   VMEM  gamma*w1 / beta*w1 (arch weight pre-folded)
    # m_ref   : (9, HW)     VMEM  SAME-padding validity mask per tap (0/1 f32)
    # out_ref : (Nb, C, HW) VMEM  lane-dense output
    # patch_ref: (9C, HW)   VMEM scratch  im2col slab in MXU dtype
    Nb, C, HW = x_ref.shape
    inv_hw = 1.0 / HW
    w0 = aw_ref[0]                       # skip-connect arch weight (scalar, SMEM)
    w = w_ref[...]                       # (C, 9C), already in the MXU dtype

    for i in range(Nb):                  # static unroll: samples in this block
        x = x_ref[i]                     # (C, HW) f32, raw input (skip path)
        xr = jnp.maximum(x, 0.0)         # ReLU before the conv

        # im2col patch slab (9C, HW): tap (di, dj) at flat position p = h*W + w
        # reads ReLU(x)[c, p + (di-1)*W + (dj-1)], zeroed outside the image.
        # Constant lane rolls run on the XLU; the downcast to the MXU dtype is
        # fused into the slab store (no separate whole-slab cast, no concat copy).
        for t in range(9):
            di, dj = t // 3, t % 3
            off = (di - 1) * W + (dj - 1)
            rows = pl.ds(t * C, C)
            if off == 0:
                patch_ref[rows, :] = xr.astype(mxu_dtype)        # center tap
            else:
                shifted = pltpu.roll(xr, (-off) % HW, axis=1)    # XLU lane rotation
                patch_ref[rows, :] = (shifted * m_ref[pl.ds(t, 1), :]).astype(mxu_dtype)

        # op1 conv: single MXU contraction with K = 9C, f32 accumulation.
        y = jnp.dot(w, patch_ref[...], preferred_element_type=jnp.float32)   # (C, HW)

        # InstanceNorm2d (eps=1e-5): shifted two-pass variance (robust when the
        # MXU operands are bf16), clamped against tiny negative rounding.
        mean = jnp.sum(y, axis=1, keepdims=True) * inv_hw                    # (C, 1)
        d = y - mean
        var = jnp.maximum(jnp.sum(d * d, axis=1, keepdims=True) * inv_hw, 0.0)
        a = gb_ref[0] * jax.lax.rsqrt(var + 1e-5)                            # gamma*w1/std

        # out = w0*x + (gamma*w1)*(y - mean)/std + beta*w1
        # op2 (_CloseWithRAMCost) contributes exactly 0 * weight[2] and is omitted.
        out_ref[i] = x * w0 + d * a + gb_ref[1]


def mixed_op_pallas(x_nchw, arch_w, conv_w_hwio, gamma, beta, *,
                    use_bf16_mxu=True, samples_per_step=None):
    """MixedOp forward.

    x_nchw: (N, C, H, W); arch_w: (3,); conv_w_hwio: (3, 3, C_in, C_out);
    gamma/beta: (C,) InstanceNorm affine parameters.
    """
    N, C, H, W = x_nchw.shape
    HW = H * W
    mxu_dtype = jnp.bfloat16 if use_bf16_mxu else jnp.float32

    # Free row-major reshape: no transpose, no pad, no extra HBM round trips.
    x_flat = x_nchw.reshape(N, C, HW).astype(jnp.float32)

    # (3, 3, C_in, C_out) -> (C_out, 9*C_in); rows match the tap-major patch
    # stacking order (tap t = di*3 + dj, then c_in).  Pre-cast to the MXU dtype
    # here: the weight block never changes, so no per-grid-step cast in-kernel.
    w_mat = (jnp.transpose(conv_w_hwio.astype(jnp.float32), (3, 0, 1, 2))
             .reshape(C, 9 * C).astype(mxu_dtype))

    arch_w = arch_w.astype(jnp.float32)
    # Fold the conv-path arch weight w1 into the InstanceNorm affine parameters.
    gb = (jnp.stack([gamma.astype(jnp.float32), beta.astype(jnp.float32)])
          * arch_w[1]).reshape(2, C, 1)

    # Per-tap SAME-padding validity masks over flattened spatial positions
    # (compile-time constants passed as a tiny replicated f32 input).
    hh = np.repeat(np.arange(H), W)
    ww = np.tile(np.arange(W), H)
    masks_np = np.zeros((9, HW), np.float32)
    for t in range(9):
        di, dj = t // 3, t % 3
        masks_np[t] = (((hh + di - 1) >= 0) & ((hh + di - 1) < H)
                       & ((ww + dj - 1) >= 0) & ((ww + dj - 1) < W)).astype(np.float32)
    masks = jnp.asarray(masks_np)

    # Samples per grid step: amortize the ~0.35 us per-step overhead, but keep at
    # least 2 parallel steps when possible so both v7x TensorCores get work.
    if samples_per_step is None:
        samples_per_step = 1
        for cand in range(2, N + 1):
            if N % cand == 0 and N // cand >= 2 and cand * C * HW * 4 <= (2 << 20):
                samples_per_step = cand
    nb = samples_per_step
    assert N % nb == 0, "samples_per_step must divide the batch size"

    # Raise the scoped-VMEM cap only once the working set outgrows the default;
    # cap at v7x's 64 MiB physical VMEM.
    bytes_mxu = jnp.dtype(mxu_dtype).itemsize
    vmem_need = (4 * nb * C * HW * 4           # x + out blocks, double-buffered
                 + 2 * C * 9 * C * bytes_mxu   # conv weight block
                 + 2 * 9 * HW * 4              # tap masks
                 + 9 * C * HW * bytes_mxu      # im2col scratch slab
                 + (1 << 20))                  # headroom
    vmem_limit = int(min(vmem_need * 3 // 2, 64 << 20)) if vmem_need > (16 << 20) else None

    kernel = functools.partial(_mixed_op_kernel, W=W, mxu_dtype=mxu_dtype)

    out_flat = pl.pallas_call(
        kernel,
        out_shape=jax.ShapeDtypeStruct((N, C, HW), jnp.float32),
        grid=(N // nb,),
        in_specs=[
            pl.BlockSpec(memory_space=pltpu.MemorySpace.SMEM),   # arch weights (3,)
            pl.BlockSpec((nb, C, HW), lambda n: (n, 0, 0)),      # x, nb samples/step
            pl.BlockSpec((C, 9 * C), lambda n: (0, 0)),          # conv weights (MXU dtype)
            pl.BlockSpec((2, C, 1), lambda n: (0, 0, 0)),        # gamma*w1 / beta*w1
            pl.BlockSpec((9, HW), lambda n: (0, 0)),             # tap validity masks
        ],
        out_specs=pl.BlockSpec((nb, C, HW), lambda n: (n, 0, 0)),
        scratch_shapes=[pltpu.VMEM((9 * C, HW), mxu_dtype)],     # im2col patch slab
        compiler_params=pltpu.CompilerParams(
            dimension_semantics=("parallel",),
            vmem_limit_bytes=vmem_limit),
    )(arch_w, x_flat, w_mat, gb, masks)

    return out_flat.reshape(N, C, H, W)


def mixed_op_reference(x_nchw, arch_w, conv_w_hwio, gamma, beta):
    """Pure-JAX reference matching the PyTorch MixedOp forward."""
    xr = jnp.maximum(x_nchw, 0.0)
    w_oihw = jnp.transpose(conv_w_hwio, (3, 2, 0, 1))
    y = jax.lax.conv_general_dilated(
        xr, w_oihw, window_strides=(1, 1), padding="SAME",
        dimension_numbers=("NCHW", "OIHW", "NCHW"))
    mean = jnp.mean(y, axis=(2, 3), keepdims=True)
    var = jnp.var(y, axis=(2, 3), keepdims=True)
    yn = (y - mean) * jax.lax.rsqrt(var + 1e-5)
    yn = yn * gamma[None, :, None, None] + beta[None, :, None, None]
    return x_nchw * arch_w[0] + yn * arch_w[1] + 0.0 * arch_w[2]


if __name__ == "__main__":
    N, C, H, W = 2, 8, 16, 16

    key = jax.random.PRNGKey(0)
    k_x, k_w, k_g, k_b, k_aw = jax.random.split(key, 5)

    x = jax.random.normal(k_x, (N, C, H, W), dtype=jnp.float32)
    # Conv2d weight in HWIO layout (3, 3, C_in, C_out).
    conv_w = jax.random.normal(k_w, (3, 3, C, C), dtype=jnp.float32) / jnp.sqrt(9.0 * C)
    # InstanceNorm affine parameters (randomized to exercise the affine path).
    gamma = 1.0 + 0.1 * jax.random.normal(k_g, (C,), dtype=jnp.float32)
    beta = 0.1 * jax.random.normal(k_b, (C,), dtype=jnp.float32)
    # Architecture weights for the 3 ops (skip, conv3x3, closed).
    arch_w = jax.nn.softmax(jax.random.normal(k_aw, (3,), dtype=jnp.float32))

    ref = mixed_op_reference(x, arch_w, conv_w, gamma, beta)

    # f32 MXU path: tight check of the kernel math.
    out_f32 = jax.block_until_ready(
        mixed_op_pallas(x, arch_w, conv_w, gamma, beta, use_bf16_mxu=False))
    assert out_f32.shape == (N, C, H, W)
    err_f32 = jnp.max(jnp.abs(out_f32 - ref))
    assert jnp.allclose(out_f32, ref, atol=1e-4, rtol=1e-4), f"f32 max abs err = {err_f32}"

    # Default path: bf16 MXU operands with f32 accumulation (looser tolerance).
    out = jax.block_until_ready(mixed_op_pallas(x, arch_w, conv_w, gamma, beta))
    assert out.shape == (N, C, H, W)
    err = jnp.max(jnp.abs(out - ref))
    assert jnp.allclose(out, ref, atol=3e-2, rtol=3e-2), f"bf16 max abs err = {err}"

    print("KERNEL_OK")
</pallas_src>

<mosaic_0001>
module attributes {stable_mosaic.version = 11 : i64} {
  func.func @_mixed_op_kernel(%arg0: i32, %arg1: memref<3xf32, #tpu.memory_space<smem>>, %arg2: memref<1x8x256xf32, #tpu.memory_space<vmem>>, %arg3: memref<8x72xf32, #tpu.memory_space<vmem>>, %arg4: memref<2x8x1xf32, #tpu.memory_space<vmem>>, %arg5: memref<9x256xf32, #tpu.memory_space<vmem>>, %arg6: memref<1x8x256xf32, #tpu.memory_space<vmem>>, %arg7: memref<72x256xf32, #tpu.memory_space<vmem>>) attributes {dimension_semantics = [#tpu.dimension_semantics<parallel>], iteration_bounds = array<i64: 2>, scalar_prefetch = 0 : i64, scratch_operands = 1 : i64, tpu.core_type = #tpu.core_type<tc>, window_params = [{transform_indices = @transform_0, window_bounds = array<i64: 3>}, {transform_indices = @transform_1, window_bounds = array<i64: 1, 8, 256>}, {pipeline_mode = #tpu.pipeline_mode<synchronous>, transform_indices = @transform_2, window_bounds = array<i64: 8, 72>}, {pipeline_mode = #tpu.pipeline_mode<synchronous>, transform_indices = @transform_3, window_bounds = array<i64: 2, 8, 1>}, {pipeline_mode = #tpu.pipeline_mode<synchronous>, transform_indices = @transform_4, window_bounds = array<i64: 9, 256>}, {transform_indices = @transform_5, window_bounds = array<i64: 1, 8, 256>}]} {
    %c0 = arith.constant 0 : index
    %0 = memref.load %arg1[%c0] : memref<3xf32, #tpu.memory_space<smem>>
    %c0_0 = arith.constant 0 : index
    %c0_1 = arith.constant 0 : index
    %1 = vector.load %arg3[%c0_0, %c0_1] : memref<8x72xf32, #tpu.memory_space<vmem>>, vector<8x72xf32>
    %c0_2 = arith.constant 0 : index
    %c0_3 = arith.constant 0 : index
    %c0_4 = arith.constant 0 : index
    %2 = vector.load %arg2[%c0_2, %c0_3, %c0_4] : memref<1x8x256xf32, #tpu.memory_space<vmem>>, vector<1x8x256xf32>
    %3 = vector.shape_cast %2 : vector<1x8x256xf32> to vector<8x256xf32>
    %cst = arith.constant 0.000000e+00 : f32
    %4 = vector.broadcast %cst : f32 to vector<8x256xf32>
    %5 = arith.maximumf %3, %4 : vector<8x256xf32>
    %c17_i32 = arith.constant 17 : i32
    %6 = tpu.dynamic_rotate %5 by %c17_i32 dim 1 : vector<8x256xf32>, i32 -> vector<8x256xf32>
    %c0_5 = arith.constant 0 : index
    %c0_6 = arith.constant 0 : index
    %7 = vector.load %arg5[%c0_5, %c0_6] : memref<9x256xf32, #tpu.memory_space<vmem>>, vector<1x256xf32>
    %8 = vector.broadcast %7 : vector<1x256xf32> to vector<8x256xf32>
    %9 = arith.mulf %6, %8 : vector<8x256xf32>
    %c0_7 = arith.constant 0 : index
    %c0_8 = arith.constant 0 : index
    %10 = vector.load %arg7[%c0_7, %c0_8] : memref<72x256xf32, #tpu.memory_space<vmem>>, vector<8x256xf32>
    tpu.vector_store %arg7[%c0_7, %c0_8], %9 {strides = array<i32>} : memref<72x256xf32, #tpu.memory_space<vmem>>, vector<8x256xf32>,
    %c16_i32 = arith.constant 16 : i32
    %11 = tpu.dynamic_rotate %5 by %c16_i32 dim 1 : vector<8x256xf32>, i32 -> vector<8x256xf32>
    %c1 = arith.constant 1 : index
    %c0_9 = arith.constant 0 : index
    %12 = vector.load %arg5[%c1, %c0_9] : memref<9x256xf32, #tpu.memory_space<vmem>>, vector<1x256xf32>
    %13 = vector.broadcast %12 : vector<1x256xf32> to vector<8x256xf32>
    %14 = arith.mulf %11, %13 : vector<8x256xf32>
    %c8 = arith.constant 8 : index
    %c0_10 = arith.constant 0 : index
    %15 = vector.load %arg7[%c8, %c0_10] : memref<72x256xf32, #tpu.memory_space<vmem>>, vector<8x256xf32>
    tpu.vector_store %arg7[%c8, %c0_10], %14 {strides = array<i32>} : memref<72x256xf32, #tpu.memory_space<vmem>>, vector<8x256xf32>,
    %c15_i32 = arith.constant 15 : i32
    %16 = tpu.dynamic_rotate %5 by %c15_i32 dim 1 : vector<8x256xf32>, i32 -> vector<8x256xf32>
    %c2 = arith.constant 2 : index
    %c0_11 = arith.constant 0 : index
    %17 = vector.load %arg5[%c2, %c0_11] : memref<9x256xf32, #tpu.memory_space<vmem>>, vector<1x256xf32>
    %18 = vector.broadcast %17 : vector<1x256xf32> to vector<8x256xf32>
    %19 = arith.mulf %16, %18 : vector<8x256xf32>
    %c16 = arith.constant 16 : index
    %c0_12 = arith.constant 0 : index
    %20 = vector.load %arg7[%c16, %c0_12] : memref<72x256xf32, #tpu.memory_space<vmem>>, vector<8x256xf32>
    tpu.vector_store %arg7[%c16, %c0_12], %19 {strides = array<i32>} : memref<72x256xf32, #tpu.memory_space<vmem>>, vector<8x256xf32>,
    %c1_i32 = arith.constant 1 : i32
    %21 = tpu.dynamic_rotate %5 by %c1_i32 dim 1 : vector<8x256xf32>, i32 -> vector<8x256xf32>
    %c3 = arith.constant 3 : index
    %c0_13 = arith.constant 0 : index
    %22 = vector.load %arg5[%c3, %c0_13] : memref<9x256xf32, #tpu.memory_space<vmem>>, vector<1x256xf32>
    %23 = vector.broadcast %22 : vector<1x256xf32> to vector<8x256xf32>
    %24 = arith.mulf %21, %23 : vector<8x256xf32>
    %c24 = arith.constant 24 : index
    %c0_14 = arith.constant 0 : index
    %25 = vector.load %arg7[%c24, %c0_14] : memref<72x256xf32, #tpu.memory_space<vmem>>, vector<8x256xf32>
    tpu.vector_store %arg7[%c24, %c0_14], %24 {strides = array<i32>} : memref<72x256xf32, #tpu.memory_space<vmem>>, vector<8x256xf32>,
    %c32 = arith.constant 32 : index
    %c0_15 = arith.constant 0 : index
    %26 = vector.load %arg7[%c32, %c0_15] : memref<72x256xf32, #tpu.memory_space<vmem>>, vector<8x256xf32>
    tpu.vector_store %arg7[%c32, %c0_15], %5 {strides = array<i32>} : memref<72x256xf32, #tpu.memory_space<vmem>>, vector<8x256xf32>,
    %c255_i32 = arith.constant 255 : i32
    %27 = tpu.dynamic_rotate %5 by %c255_i32 dim 1 : vector<8x256xf32>, i32 -> vector<8x256xf32>
    %c5 = arith.constant 5 : index
    %c0_16 = arith.constant 0 : index
    %28 = vector.load %arg5[%c5, %c0_16] : memref<9x256xf32, #tpu.memory_space<vmem>>, vector<1x256xf32>
    %29 = vector.broadcast %28 : vector<1x256xf32> to vector<8x256xf32>
    %30 = arith.mulf %27, %29 : vector<8x256xf32>
    %c40 = arith.constant 40 : index
    %c0_17 = arith.constant 0 : index
    %31 = vector.load %arg7[%c40, %c0_17] : memref<72x256xf32, #tpu.memory_space<vmem>>, vector<8x256xf32>
    tpu.vector_store %arg7[%c40, %c0_17], %30 {strides = array<i32>} : memref<72x256xf32, #tpu.memory_space<vmem>>, vector<8x256xf32>,
    %c241_i32 = arith.constant 241 : i32
    %32 = tpu.dynamic_rotate %5 by %c241_i32 dim 1 : vector<8x256xf32>, i32 -> vector<8x256xf32>
    %c6 = arith.constant 6 : index
    %c0_18 = arith.constant 0 : index
    %33 = vector.load %arg5[%c6, %c0_18] : memref<9x256xf32, #tpu.memory_space<vmem>>, vector<1x256xf32>
    %34 = vector.broadcast %33 : vector<1x256xf32> to vector<8x256xf32>
    %35 = arith.mulf %32, %34 : vector<8x256xf32>
    %c48 = arith.constant 48 : index
    %c0_19 = arith.constant 0 : index
    %36 = vector.load %arg7[%c48, %c0_19] : memref<72x256xf32, #tpu.memory_space<vmem>>, vector<8x256xf32>
    tpu.vector_store %arg7[%c48, %c0_19], %35 {strides = array<i32>} : memref<72x256xf32, #tpu.memory_space<vmem>>, vector<8x256xf32>,
    %c240_i32 = arith.constant 240 : i32
    %37 = tpu.dynamic_rotate %5 by %c240_i32 dim 1 : vector<8x256xf32>, i32 -> vector<8x256xf32>
    %c7 = arith.constant 7 : index
    %c0_20 = arith.constant 0 : index
    %38 = vector.load %arg5[%c7, %c0_20] : memref<9x256xf32, #tpu.memory_space<vmem>>, vector<1x256xf32>
    %39 = vector.broadcast %38 : vector<1x256xf32> to vector<8x256xf32>
    %40 = arith.mulf %37, %39 : vector<8x256xf32>
    %c56 = arith.constant 56 : index
    %c0_21 = arith.constant 0 : index
    %41 = vector.load %arg7[%c56, %c0_21] : memref<72x256xf32, #tpu.memory_space<vmem>>, vector<8x256xf32>
    tpu.vector_store %arg7[%c56, %c0_21], %40 {strides = array<i32>} : memref<72x256xf32, #tpu.memory_space<vmem>>, vector<8x256xf32>,
    %c239_i32 = arith.constant 239 : i32
    %42 = tpu.dynamic_rotate %5 by %c239_i32 dim 1 : vector<8x256xf32>, i32 -> vector<8x256xf32>
    %c8_22 = arith.constant 8 : index
    %c0_23 = arith.constant 0 : index
    %43 = vector.load %arg5[%c8_22, %c0_23] : memref<9x256xf32, #tpu.memory_space<vmem>>, vector<1x256xf32>
    %44 = vector.broadcast %43 : vector<1x256xf32> to vector<8x256xf32>
    %45 = arith.mulf %42, %44 : vector<8x256xf32>
    %c64 = arith.constant 64 : index
    %c0_24 = arith.constant 0 : index
    %46 = vector.load %arg7[%c64, %c0_24] : memref<72x256xf32, #tpu.memory_space<vmem>>, vector<8x256xf32>
    tpu.vector_store %arg7[%c64, %c0_24], %45 {strides = array<i32>} : memref<72x256xf32, #tpu.memory_space<vmem>>, vector<8x256xf32>,
    %c0_25 = arith.constant 0 : index
    %c0_26 = arith.constant 0 : index
    %47 = vector.load %arg7[%c0_25, %c0_26] : memref<72x256xf32, #tpu.memory_space<vmem>>, vector<72x256xf32>
    %cst_27 = arith.constant dense<0.000000e+00> : vector<8x256xf32>
    %48 = tpu.matmul %1, %47, %cst_27 {dimension_numbers = #tpu.dot_dimension_numbers<[1], [0], [0], [1], [0, 0, 1, 1], [], []>} : vector<8x72xf32>, vector<72x256xf32>, vector<8x256xf32> -> vector<8x256xf32>
    %cst_28 = arith.constant dense<0.000000e+00> : vector<8xf32>
    %49 = vector.multi_reduction <add>, %48, %cst_28 [1] : vector<8x256xf32> to vector<8xf32>
    %50 = vector.shape_cast %49 : vector<8xf32> to vector<8x1xf32>
    %cst_29 = arith.constant 3.906250e-03 : f32
    %51 = vector.broadcast %cst_29 : f32 to vector<8x1xf32>
    %52 = arith.mulf %50, %51 : vector<8x1xf32>
    %53 = vector.broadcast %52 : vector<8x1xf32> to vector<8x256xf32>
    %54 = arith.subf %48, %53 : vector<8x256xf32>
    %55 = arith.mulf %54, %54 : vector<8x256xf32>
    %cst_30 = arith.constant dense<0.000000e+00> : vector<8xf32>
    %56 = vector.multi_reduction <add>, %55, %cst_30 [1] : vector<8x256xf32> to vector<8xf32>
    %57 = vector.shape_cast %56 : vector<8xf32> to vector<8x1xf32>
    %cst_31 = arith.constant 3.906250e-03 : f32
    %58 = vector.broadcast %cst_31 : f32 to vector<8x1xf32>
    %59 = arith.mulf %57, %58 : vector<8x1xf32>
    %cst_32 = arith.constant 0.000000e+00 : f32
    %60 = vector.broadcast %cst_32 : f32 to vector<8x1xf32>
    %61 = arith.maximumf %59, %60 : vector<8x1xf32>
    %c0_33 = arith.constant 0 : index
    %c0_34 = arith.constant 0 : index
    %c0_35 = arith.constant 0 : index
    %62 = vector.load %arg4[%c0_33, %c0_34, %c0_35] : memref<2x8x1xf32, #tpu.memory_space<vmem>>, vector<1x8x1xf32>
    %63 = vector.shape_cast %62 : vector<1x8x1xf32> to vector<8x1xf32>
    %cst_36 = arith.constant 9.99999974E-6 : f32
    %64 = vector.broadcast %cst_36 : f32 to vector<8x1xf32>
    %65 = arith.addf %61, %64 : vector<8x1xf32>
    %66 = math.rsqrt %65 : vector<8x1xf32>
    %67 = arith.mulf %63, %66 : vector<8x1xf32>
    %68 = vector.broadcast %0 : f32 to vector<8x256xf32>
    %69 = arith.mulf %3, %68 : vector<8x256xf32>
    %70 = vector.broadcast %67 : vector<8x1xf32> to vector<8x256xf32>
    %71 = arith.mulf %54, %70 : vector<8x256xf32>
    %72 = arith.addf %69, %71 : vector<8x256xf32>
    %c1_37 = arith.constant 1 : index
    %c0_38 = arith.constant 0 : index
    %c0_39 = arith.constant 0 : index
    %73 = vector.load %arg4[%c1_37, %c0_38, %c0_39] : memref<2x8x1xf32, #tpu.memory_space<vmem>>, vector<1x8x1xf32>
    %74 = vector.shape_cast %73 : vector<1x8x1xf32> to vector<8x1xf32>
    %75 = vector.broadcast %74 : vector<8x1xf32> to vector<8x256xf32>
    %76 = arith.addf %72, %75 : vector<8x256xf32>
    %c0_40 = arith.constant 0 : index
    %c0_41 = arith.constant 0 : index
    %c0_42 = arith.constant 0 : index
    %77 = vector.load %arg6[%c0_40, %c0_41, %c0_42] : memref<1x8x256xf32, #tpu.memory_space<vmem>>, vector<1x8x256xf32>
    %78 = vector.shape_cast %77 : vector<1x8x256xf32> to vector<8x256xf32>
    %79 = vector.shape_cast %76 : vector<8x256xf32> to vector<1x8x256xf32>
    tpu.vector_store %arg6[%c0_40, %c0_41, %c0_42], %79 {strides = array<i32>} : memref<1x8x256xf32, #tpu.memory_space<vmem>>, vector<1x8x256xf32>,
    return
  }
  func.func @transform_0(%arg0: i32) -> i32 {
    %c0_i32 = arith.constant 0 : i32
    %c0_i32_0 = arith.constant 0 : i32
    return %c0_i32 : i32
  }
  func.func @transform_1(%arg0: i32) -> (i32, i32, i32) {
    %c0_i32 = arith.constant 0 : i32
    %c0_i32_0 = arith.constant 0 : i32
    %c0_i32_1 = arith.constant 0 : i32
    return %arg0, %c0_i32, %c0_i32_0 : i32, i32, i32
  }
  func.func @transform_2(%arg0: i32) -> (i32, i32) {
    %c0_i32 = arith.constant 0 : i32
    %c0_i32_0 = arith.constant 0 : i32
    %c0_i32_1 = arith.constant 0 : i32
    return %c0_i32, %c0_i32_0 : i32, i32
  }
  func.func @transform_3(%arg0: i32) -> (i32, i32, i32) {
    %c0_i32 = arith.constant 0 : i32
    %c0_i32_0 = arith.constant 0 : i32
    %c0_i32_1 = arith.constant 0 : i32
    %c0_i32_2 = arith.constant 0 : i32
    return %c0_i32, %c0_i32_0, %c0_i32_1 : i32, i32, i32
  }
  func.func @transform_4(%arg0: i32) -> (i32, i32) {
    %c0_i32 = arith.constant 0 : i32
    %c0_i32_0 = arith.constant 0 : i32
    %c0_i32_1 = arith.constant 0 : i32
    return %c0_i32, %c0_i32_0 : i32, i32
  }
  func.func @transform_5(%arg0: i32) -> (i32, i32, i32) {
    %c0_i32 = arith.constant 0 : i32
    %c0_i32_0 = arith.constant 0 : i32
    %c0_i32_1 = arith.constant 0 : i32
    return %arg0, %c0_i32, %c0_i32_0 : i32, i32, i32
  }
}

</mosaic_0001>

<bundles_post_ra>
// kernel: tpu_custom_call.1
= control target key start
LH: loop header
LB: loop body
LE: loop exit
PB: predicated region body
PF: predicated region fallthrough
CT: control target
= control target key end

     0   :  { %10 = vsyncpa [#allocation6], 0  ;;  %s1143_s0 = inlined_call_operand.vmem [shape: f32[3], index: 0, kind: input, shape index: {}]   ;;  %s1144_s1 = inlined_call_operand.hbm [shape: f32[2,8,256], index: 1, kind: input, shape index: {}]   ;;  %s1145_s2 = inlined_call_operand.vmem [shape: f32[8,72], index: 2, kind: input, shape index: {}]   ;;  %s1146_s3 = inlined_call_operand.vmem [shape: f32[2,8,1], index: 3, kind: input, shape index: {}]   ;;  %s1147_s4 = inlined_call_operand.hbm [shape: f32[9,256], index: 4, kind: input, shape index: {}]   ;;  %s1148_s5 = inlined_call_operand.hbm [shape: f32[2,8,256], index: 5, kind: output, shape index: {}]  }
   0x1   :  { %11 = vsyncpa [#allocation4], 0 }
   0x2   :  { %13 = vsyncpa [#allocation4 + $0x1], 0 }
   0x3   :  { %14 = vsyncpa [#allocation9], 0 }
   0x4   :  { %15 = vsyncpa [#allocation5], 0 }
   0x5   :  { %17 = vsyncpa [#allocation5 + $0x1], 0  ;;  %s945_s18 = smov 0   ;;  %s947_s19 = smov 0  }
   0x6   :  { %s949_s20 = smov 0   ;;  %s951_s21 = smov 0  }
   0x7 LB: > { %s966_s22 = sadd.s32 4294967295, %s900_s21   ;;  %s647_s23 = sadd.s32 4294967294, %s900_s21   ;;  %s900_s21 = sphi %s951_s21, %s1158_s21   ;;  %s896_s20 = sphi %s949_s20, %s1157_s20   ;;  %s892_s19 = sphi %s947_s19, %s1156_s19   ;;  %s888_s18 = sphi %s945_s18, %s1155_s18  }
   0x8   : > { %p64_p0 = scmp.ne.s32.totalorder %s892_s19, %s888_s18  ;;  %p65_p1 = scmp.eq.s32.totalorder %s966_s22, 0 }
   0x9   : > { %p151_p2 = scmp.eq.s32.totalorder %s966_s22, 1  ;;  %p157_p3 = scmp.eq.s32.totalorder %s647_s23, 1 }
   0xa   : > { %p975_p4 = por %p65_p1, %p64_p0  ;;  %p648_p5 = scmp.ge.s32.totalorder %s900_s21, 1 }
   0xb   : > { %p980_p6 = por %p157_p3, %p64_p0  ;;  %p164_p7 = scmp.lt.s32.totalorder %s900_s21, 3 }
   0xc   : > { %s176_s28 = sshll.u32 %s1143_s0, 4  ;;  %s191_s7 = sshll.u32 %s1147_s4, 4  ;;  %s177_s28 = int_to_ptr.vmem [resolvable:$true] %s176_s28  ;;  %s192_s7 = int_to_ptr.hbm [resolvable:$true] %s191_s7 }
   0xd   : > { %p988_p8 = pnand %p648_p5, %p164_p7  ;;  %s902_s8 = smov [#allocation8]  }
   0xe   : > { %s193_s9 = sshll.u32 %s902_s8, 4  ;;  %s903_s10 = smov [#allocation3]   ;;  %s194_s9 = int_to_ptr.vmem [resolvable:$true] %s193_s9 }
   0xf   : > { %p682_p10 = pneg %p988_p8  ;;  %s904_s11 = smov 256  }
  0x10   : > { %s905_s12 = smov 16   ;;  %s1001_s13 = sadd.s32 1, %s900_s21  }
  0x11   : > { %p683_p11 = pnand %p682_p10, %p65_p1  ;;  %s48_s14 = ssub.s32 %s900_s21, %s1001_s13 }
  0x12   : > { %p49_p12 = scmp.eq.s32.totalorder %s48_s14, 0  ;;  %s51_s15 = sadd.s32 1, %s896_s20 }
  0x13   : > { %685 = dma.vmem_to_smem (!%p683_p11), %s177_s28, 16, %s903_s10, [#allocation6]  }
  0x14   : > { %688 = dma.hbm_to_vmem [thread:$0]  (!%p683_p11), %s192_s7, 512, %s194_s9, [#allocation9], %s904_s11, %s904_s11, %s905_s12  }
  0x15   : > { %p58_p13 = scmp.ne.s32.totalorder %s896_s20, %s892_s19  ;;  %p59_p0 = scmp.eq.s32.totalorder %s900_s21, 0 }
  0x16   : > { %s1010_s16 = scalar_select %p49_p12, %s896_s20, %s51_s15  }
  0x17   : > { %p60_p3 = por %p59_p0, %p58_p13  ;;  %p1014_p5 = por %p151_p2, %p58_p13 }
  0x18   : > { %p699_p7 = scmp.lt.s32.totalorder %s900_s21, 2  ;;  %s207_s23 = sand.u32 1, %s896_s20  }
  0x19   : > { %s652_s26 = sshll.u32 %s207_s23, 4  ;;  %s668_s27 = sshll.u32 %s900_s21, 4 }
  0x1a   : > { %s216_s6 = scalar_lea.hbm %s1144_s1, %s668_s27  ;;  %s211_s7 = scalar_lea.vmem [#allocation7], %s652_s26 }
  0x1b   : > { %s220_s8 = sshll.u32 %s211_s7, 4  ;;  %s218_s9 = sshll.u32 %s216_s6, 4  ;;  %s221_s8 = int_to_ptr.vmem [resolvable:$true] %s220_s8  ;;  %s219_s9 = int_to_ptr.hbm [resolvable:$true] %s218_s9 }
  0x1c   : > { %p1024_p10 = pnand %p699_p7, %p60_p3  ;;  %s208_s11 = scalar_lea.sflag [#allocation4], %s207_s23 }
  0x1d   : > { %s796_s12 = sshra.s32 %s219_s9, 4  ;;  %s803_s27 = scalar_lea.hbm %s1144_s1, 32  ;;  %s797_s12 = int_to_ptr.hbm [resolvable:$true] %s796_s12 }
  0x1e   : > { %s798_s14 = scalar_lea.hbm %s797_s12, 16  ;;  %p800_p11 = pneg %p1024_p10 }
  0x1f   : > { %p799_p2 = scmp.ne.s32.totalorder %s797_s12, %s798_s14  ;;  %p804_p0 = scmp.lt.s32.totalorder %s797_s12, %s1144_s1 }
  0x20   : > { %p805_p3 = scmp.lt.s32.totalorder %s803_s27, %s798_s14 }
  0x21   : > { %p801_p12 = pnand %p800_p11, %p799_p2 }
  0x22   : > { %p806_p7 = por %p805_p3, %p804_p0 }
  0x23   : > { %p802_p13 = pneg %p801_p12 }
  0x25   : > { %p807_p9 = pnand %p806_p7, %p802_p13 }
  0x27   : > { %810 = shalt.err (!%p807_p9)
}
  0x28   : > { %692 = dma.hbm_to_vmem [thread:$0]  (!%p1024_p10), %s219_s9, 256, %s221_s8, %s208_s11  }
  0x29   : > { %229 = sbr.rel (%p988_p8) target bundleno = 740 (0x2e4), region = 40 }
  0x2e   : > { %871 = dma.done.wait (%p65_p1), [#allocation6], 16  }
  0x2f   : > { %873 = vsyncadd (%p65_p1), [#allocation6], 4294967280  ;;  %s1045_s23 = sand.u32 1, %s892_s19  }
  0x30   : > { %s657_s6 = sshll.u32 %s1045_s23, 4  ;;  %s237_s7 = scalar_lea.sflag [#allocation4], %s1045_s23 }
  0x31   : > { %s240_s8 = scalar_lea.vmem [#allocation7], %s657_s6 }
  0x32   : > { %875 = dma.done.wait (%p975_p4), %s237_s7, 256  }
  0x33   : > { %877 = vsyncadd (%p975_p4), %s237_s7, 4294967040 }
  0x34   : > { %879 = dma.done.wait (%p65_p1), [#allocation9], 512  }
  0x35   : > { %881 = vsyncadd (%p65_p1), [#allocation9], 4294966784 }
  0x36   : > { %251 = sfence }
  0x37   : > { %v1059_v0 = vld [vmem:[%s240_s8] sm:$0xff]  ;;  %s906_s29 = smov 112   ;;  %s907_s9 = smov 111   ;;  %v1066_v2 = vld [vmem:[%s240_s8 + $0x8] sm:$0xff]  ;;  %v284_v5 = vlaneseq  ;;  %vm445_vm8 = vcmask 588800  }
  0x38   : > { %v1062_v1 = vmax.f32 %v1059_v0, 0.0  ;;  %s908_s24 = smov 113   ;;  %v1070_v3 = vmax.f32 %v1066_v2, 0.0  ;;  %s909_s10 = smov 127  }
  0x39   : > { %s910_s11 = smov 1   ;;  %s911_s12 = smov 15   ;;  %v1085_v8 = vand.u32 127, %v284_v5  ;;  %v417_v9 = vld [vmem:[#allocation8 + $0x10] ss:$8 sm:$0x3] }
  0x3a   : > { %391 = vrot.lane.b32.xlu1 %v1062_v1, %s906_s29  ;;  %409 = vrot.lane.b32.xlu0 %v1062_v1, %s907_s9  ;;  %s912_s14 = smov 16   ;;  %s913_s15 = smov 17   ;;  %v399_v11 = vld [vmem:[#allocation8 + $0x7] ss:$8 sm:$0x3]  ;;  %v419_v12 = vperm.slane %v417_v9, 0 }
  0x3b   : > { %373 = vrot.lane.b32.xlu2 %v1062_v1, %s908_s24  ;;  %vm395_vm0 = vcmp.lt.s32.totalorder %v1085_v8, 112  ;;  %vm413_vm1 = vcmp.lt.s32.totalorder %v1085_v8, 111  ;;  %v420_v13 = vperm.slane %v417_v9, 1  ;;  %v381_v14 = vld [vmem:[#allocation8 + $0x6] ss:$8 sm:$0x3] }
  0x3c   : > { %vm377_vm2 = vcmp.lt.s32.totalorder %v1085_v8, 113  ;;  %v401_v17 = vperm.slane %v399_v11, 0  ;;  %v402_v18 = vperm.slane %v399_v11, 1  ;;  %v383_v25 = vperm.slane %v381_v14, 0 }
  0x3d   : > { %v384_v26 = vperm.slane %v381_v14, 1  ;;  %v363_v29 = vld [vmem:[#allocation8 + $0x5] ss:$8 sm:$0x3]  ;;  %vm359_vm3 = vcmp.lt.s32.totalorder %v1085_v8, 127  ;;  %vm339_vm4 = vcmp.lt.s32.totalorder %v1085_v8, 1 }
  0x3e   : > { %v365_v35 = vperm.slane %v363_v29, 0  ;;  %v366_v36 = vperm.slane %v363_v29, 1  ;;  %v343_v43 = vld [vmem:[#allocation8 + $0x3] ss:$8 sm:$0x3]  ;;  %vm321_vm5 = vcmp.lt.s32.totalorder %v1085_v8, 15 }
  0x3f   : > { %v325_v44 = vld [vmem:[#allocation8 + $0x2] ss:$8 sm:$0x3]  ;;  %v345_v45 = vperm.slane %v343_v43, 0  ;;  %v346_v46 = vperm.slane %v343_v43, 1  ;;  %vm303_vm6 = vcmp.lt.s32.totalorder %v1085_v8, 16 }
  0x40   : > { %v327_v48 = vperm.slane %v325_v44, 0  ;;  %v328_v49 = vperm.slane %v325_v44, 1  ;;  %v307_v60 = vld [vmem:[#allocation8 + $0x1] ss:$8 sm:$0x3]  ;;  %vm286_vm7 = vcmp.lt.s32.totalorder %v1085_v8, 17 }
  0x41   : > { %v309_v61 = vperm.slane %v307_v60, 0  ;;  %v310_v62 = vperm.slane %v307_v60, 1 }
  0x42   : > { %393 = vrot.lane.b32.xlu1 %v1070_v3, %s906_s29  ;;  %411 = vrot.lane.b32.xlu0 %v1070_v3, %s907_s9  ;;  %s274_s29 = sld [smem:[#allocation3]]  ;;  %s669_s9 = sshll.u32 %s966_s22, 4 }
  0x43   : > { %375 = vrot.lane.b32.xlu2 %v1070_v3, %s908_s24  ;;  %s539_s22 = scalar_lea.sflag [#allocation5], %s1045_s23 }
  0x48   : > { %v515_v43 = vstv %s274_s29 }
  0x4a   : > { %357 = vrot.lane.b32.xlu1 %v1070_v3, %s909_s10  ;;  %355 = vrot.lane.b32.xlu0 %v1062_v1, %s909_s10 }
  0x4b   : > { %335 = vrot.lane.b32.xlu2 %v1062_v1, %s910_s11 }
  0x52   : > { %317 = vrot.lane.b32.xlu1 %v1062_v1, %s911_s12  ;;  %337 = vrot.lane.b32.xlu0 %v1070_v3, %s910_s11  ;;  %s550_s11 = scalar_lea.hbm %s1148_s5, %s669_s9 }
  0x53   : > { %319 = vrot.lane.b32.xlu2 %v1070_v3, %s911_s12  ;;  %s273_s12 = scalar_lea.vmem [#allocation10], %s657_s6  ;;  %s846_s6 = scalar_lea.hbm %s1148_s5, 32 }
  0x5a   : > { %301 = vrot.lane.b32.xlu1 %v1070_v3, %s912_s14  ;;  %299 = vrot.lane.b32.xlu0 %v1062_v1, %s912_s14  ;;  %s552_s14 = sshll.u32 %s273_s12, 4  ;;  %s553_s14 = int_to_ptr.vmem [resolvable:$true] %s552_s14 }
  0x5b   : > { %280 = vrot.lane.b32.xlu2 %v1062_v1, %s913_s15 }
  0x62   : > { %282 = vrot.lane.b32.xlu0 %v1070_v3, %s913_s15  ;;  %s554_s15 = sshll.u32 %s550_s11, 4  ;;  %s555_s15 = int_to_ptr.hbm [resolvable:$true] %s554_s15 }
  0x63   : > { %s840_s26 = sshra.s32 %s555_s15, 4  ;;  %s841_s26 = int_to_ptr.hbm [resolvable:$true] %s840_s26 }
  0x64   : > { %s842_s27 = scalar_lea.hbm %s841_s26, 16  ;;  %p847_p9 = scmp.lt.s32.totalorder %s841_s26, %s1148_s5 }
  0x65   : > { %p843_p1 = scmp.ne.s32.totalorder %s841_s26, %s842_s27  ;;  %p848_p10 = scmp.lt.s32.totalorder %s846_s6, %s842_s27 }
  0x67   : > { %p844_p4 = pnand %p843_p1, %p1014_p5  ;;  %p849_p2 = por %p848_p10, %p847_p9 }
  0x69   : > { %p845_p8 = pneg %p844_p4 }
  0x6b   : > { %p850_p11 = pnand %p849_p2, %p845_p8 }
  0x95   : > { %v374_v4 = vpop.permute.xlu2 %373 }
  0x9d   : > { %v376_v10 = vpop.permute.xlu2 %375 }
  0x9e   : > { %v378_v27 = vsel %vm377_vm2, %v374_v4, %v376_v10  ;;  %v379_v28 = vsel %vm377_vm2, %v376_v10, %v374_v4 }
  0x9f   : > { %v387_v33 = vmul.f32 %v383_v25, %v378_v27  ;;  %v388_v34 = vmul.f32 %v384_v26, %v379_v28  ;;  %v914_v27 = vmov 0  }
  0xa0   : > { %748 = vset.pattern.permute.xlu0 %v914_v27 }
  0xa5   : > { %v336_v32 = vpop.permute.xlu2 %335 }
  0xac   : > { %v392_v6 = vpop.permute.xlu1 %391  ;;  %v410_v7 = vpop.permute.xlu0 %409 }
  0xad   : > { %v320_v47 = vpop.permute.xlu2 %319 }
  0xb4   : > { %v394_v15 = vpop.permute.xlu1 %393  ;;  %v412_v16 = vpop.permute.xlu0 %411 }
  0xb5   : > { %v396_v19 = vsel %vm395_vm0, %v392_v6, %v394_v15  ;;  %v397_v20 = vsel %vm395_vm0, %v394_v15, %v392_v6  ;;  %v414_v21 = vsel %vm413_vm1, %v410_v7, %v412_v16  ;;  %v415_v22 = vsel %vm413_vm1, %v412_v16, %v410_v7  ;;  %v289_v7 = vld [vmem:[#allocation8] ss:$8 sm:$0x3]  ;;  %v281_v9 = vpop.permute.xlu2 %280 }
  0xb6   : > { %v423_v23 = vmul.f32 %v419_v12, %v414_v21  ;;  %v424_v24 = vmul.f32 %v420_v13, %v415_v22  ;;  %v405_v30 = vmul.f32 %v401_v17, %v396_v19  ;;  %v406_v31 = vmul.f32 %v402_v18, %v397_v20  ;;  %v275_v17 = vld [vmem:[%s1145_s2] sm:$0xff] }
  0xb7   : > { %v291_v10 = vperm.slane %v289_v7, 0  ;;  %v292_v11 = vperm.slane %v289_v7, 1 }
  0xb8   : > { %456 = vmatpush.msra.mxu0 %v423_v23  ;;  %476 = vmatpush.msra.mxu1 %v424_v24 }
  0xba   : > { %457 = vmatpush.msra.mxu0 %v405_v30  ;;  %477 = vmatpush.msra.mxu1 %v406_v31 }
  0xbc   : > { %v358_v37 = vpop.permute.xlu1 %357  ;;  %458 = vmatpush.msra.mxu0 %v387_v33  ;;  %478 = vmatpush.msra.mxu1 %v388_v34  ;;  %v356_v38 = vpop.permute.xlu0 %355 }
  0xbd   : > { %v360_v39 = vsel %vm359_vm3, %v356_v38, %v358_v37  ;;  %v361_v40 = vsel %vm359_vm3, %v358_v37, %v356_v38  ;;  %v502_v37 = vld [vmem:[%s1146_s3] sm:$0xff] }
  0xbe   : > { %v369_v41 = vmul.f32 %v365_v35, %v360_v39  ;;  %v370_v42 = vmul.f32 %v366_v36, %v361_v40 }
  0xc0   : > { %459 = vmatpush.msra.mxu0 %v369_v41  ;;  %479 = vmatpush.msra.mxu1 %v370_v42  ;;  %v662_v41 = vld [vmem:[%s1146_s3 + $0x8] sm:$0xff] }
  0xc2   : > { %460 = vmatpush.msra.mxu0 %v1062_v1  ;;  %480 = vmatpush.msra.mxu1 %v1070_v3 }
  0xc4   : > { %v318_v50 = vpop.permute.xlu1 %317  ;;  %v338_v51 = vpop.permute.xlu0 %337 }
  0xc5   : > { %v340_v52 = vsel %vm339_vm4, %v336_v32, %v338_v51  ;;  %v341_v53 = vsel %vm339_vm4, %v338_v51, %v336_v32  ;;  %v322_v54 = vsel %vm321_vm5, %v318_v50, %v320_v47  ;;  %v323_v55 = vsel %vm321_vm5, %v320_v47, %v318_v50 }
  0xc6   : > { %v349_v56 = vmul.f32 %v345_v45, %v341_v53  ;;  %v350_v57 = vmul.f32 %v346_v46, %v340_v52  ;;  %v331_v58 = vmul.f32 %v327_v48, %v323_v55  ;;  %v332_v59 = vmul.f32 %v328_v49, %v322_v54 }
  0xc7   : > { %v516_v46 = vmul.f32 %v515_v43, %v1059_v0  ;;  %v517_v47 = vmul.f32 %v515_v43, %v1066_v2 }
  0xc8   : > { %461 = vmatpush.msra.mxu0 %v349_v56  ;;  %481 = vmatpush.msra.mxu1 %v350_v57 }
  0xca   : > { %462 = vmatpush.msra.mxu0 %v331_v58  ;;  %482 = vmatpush.msra.mxu1 %v332_v59 }
  0xcc   : > { %v302_v63 = vpop.permute.xlu1 %301  ;;  %v300_v1 = vpop.permute.xlu0 %299 }
  0xcd   : > { %v304_v3 = vsel %vm303_vm6, %v300_v1, %v302_v63  ;;  %v305_v4 = vsel %vm303_vm6, %v302_v63, %v300_v1 }
  0xce   : > { %v313_v5 = vmul.f32 %v309_v61, %v305_v4  ;;  %v314_v6 = vmul.f32 %v310_v62, %v304_v3 }
  0xd0   : > { %463 = vmatpush.msra.mxu0 %v313_v5  ;;  %483 = vmatpush.msra.mxu1 %v314_v6 }
  0xd4   : > { %v283_v12 = vpop.permute.xlu0 %282 }
  0xd5   : > { %v287_v13 = vsel %vm286_vm7, %v281_v9, %v283_v12  ;;  %v288_v14 = vsel %vm286_vm7, %v283_v12, %v281_v9 }
  0xd6   : > { %v295_v15 = vmul.f32 %v291_v10, %v288_v14  ;;  %v296_v16 = vmul.f32 %v292_v11, %v287_v13 }
  0xd8   : > { %464 = vmatpush.msra.mxu0 %v295_v15  ;;  %484 = vmatpush.msra.mxu1 %v296_v16 }
  0xd9   : > { %660 = vmatmul.msk.f32.vlgmr.msra.gmra.mxu0 %vm445_vm8, %v275_v17  ;;  %661 = vmatmul.msk.f32.vlgmr.msra.gmra.mxu1 %vm445_vm8, %v275_v17 }
 0x156   : > { %v466_v18 = vpop.f32.mrf.mxu0  ;;  %v486_v19 = vpop.f32.mrf.mxu1 }
 0x157   : > { %v489_v20 = vadd.f32 %v486_v19, %v466_v18 }
 0x159   : > { %490 = vadd.xlane.f32.xlu1 %v489_v20 }
 0x1cc   : > { %v491_v8 = vpop.xlane.xlu1 %490 }
 0x1cd   : > { %v492_v21 = vmul.f32 0.00390625, %v491_v8 }
 0x1cf   : > { %v493_v22 = vsub.f32 %v466_v18, %v492_v21  ;;  %v494_v23 = vsub.f32 %v486_v19, %v492_v21 }
 0x1d1   : > { %v495_v24 = vmul.f32 %v493_v22, %v493_v22  ;;  %v496_v25 = vmul.f32 %v494_v23, %v494_v23 }
 0x1d3   : > { %v497_v26 = vadd.f32 %v496_v25, %v495_v24 }
 0x1d5   : > { %498 = vadd.xlane.f32.xlu2 %v497_v26 }
 0x248   : > { %v499_v28 = vpop.xlane.xlu2 %498 }
 0x249   : > { %v500_v29 = vmul.f32 0.00390625, %v499_v28 }
 0x24b   : > { %v501_v30 = vmax.f32 %v500_v29, 0.0 }
 0x24d   : > { %v503_v31 = vadd.f32 1e-05, %v501_v30 }
 0x24f   : > { %749 = vrsqrt.f32 %v503_v31  ;;  %vm510_vm10 = vweird.f32 %v503_v31 }
 0x255   : > { %v750_v32 = vpop.eup %749 }
 0x256   : > { %v505_v33 = vmul.f32 %v750_v32, %v503_v31  ;;  %vm511_vm9 = vweird.f32 %v750_v32 }
 0x257   : > { %vm512_vm11 = vmor %vm510_vm10, %vm511_vm9 }
 0x258   : > { %v506_v34 = vmul.f32 %v750_v32, %v505_v33 }
 0x25a   : > { %v507_v35 = vmul.f32 0.5, %v506_v34 }
 0x25c   : > { %v508_v36 = vsub.f32 1.5, %v507_v35 }
 0x25e   : > { %v509_v38 = vmul.f32 %v750_v32, %v508_v36 }
 0x260   : > { %v513_v39 = vsel %vm512_vm11, %v750_v32, %v509_v38 }
 0x261   : > { %v514_v40 = vmul.f32 %v513_v39, %v502_v37 }
 0x263   : > { %520 = vperm.xlu0 %748, %v514_v40  }
 0x26b   : > { %531 = vperm.xlu0 %748, %v662_v41  }
 0x2d5   : > { %v521_v42 = vpop.permute.xlu0 %520 }
 0x2d6   : > { %v523_v44 = vmul.f32 %v521_v42, %v493_v22  ;;  %v524_v45 = vmul.f32 %v521_v42, %v494_v23 }
 0x2d8   : > { %v525_v48 = vadd.f32 %v523_v44, %v516_v46  ;;  %v526_v49 = vadd.f32 %v524_v45, %v517_v47 }
 0x2dd   : > { %v532_v50 = vpop.permute.xlu0 %531 }
 0x2de   : > { %v534_v51 = vadd.f32 %v532_v50, %v525_v48  ;;  %v535_v52 = vadd.f32 %v532_v50, %v526_v49 }
 0x2e0   : > { %536 = vst [vmem:[%s273_s12] sm:$0xff] %v534_v51 }
 0x2e1   : > { %537 = vst [vmem:[%s273_s12 + $0x8] sm:$0xff] %v535_v52 }
 0x2e2   : > { %853 = shalt.err (!%p850_p11)
}
 0x2e3   : > { %680 = dma.vmem_to_hbm [thread:$0]  (%p1014_p5), %s553_s14, 256, %s555_s15, %s539_s22  }
 0x2e4 PF: > { %s566_s23 = sand.u32 1, %s888_s18   ;;  %p1154_p12 = scmp.ge.s32.totalorder %s900_s21, 2 }
 0x2e5   : > { %s567_s29 = scalar_lea.sflag [#allocation5], %s566_s23 }
 0x2e6   : > { %p694_p13 = pnand %p1154_p12, %p980_p6 }
 0x2e8   : > { %p695_p0 = pneg %p694_p13 }
 0x2ea   : > { %883 = dma.done.wait (%p695_p0), %s567_s29, 256  }
 0x2eb   : > { %885 = vsyncadd (%p695_p0), %s567_s29, 4294967040  ;;  %p20_p3 = scmp.ge.s32.totalorder %s1001_s13, 4   ;;  %s1155_s18 = smov %s892_s19 }
 0x2ec   : > { %s1156_s19 = smov %s896_s20  ;;  %s1157_s20 = smov %s1010_s16 }
 0x2ed   : > { %s1158_s21 = smov %s1001_s13  ;;  %22 = sbr.rel (!%p20_p3) target bundleno = 7 (0x7), region = 102 }
 0x2f2   :  { %573 = vsyncpa [#allocation4], 1 }
 0x2f3   :  { %575 = vsyncpa [#allocation4 + $0x1], 1 }
 0x2f4   :  { %576 = vsyncpa [#allocation9], 1 }
 0x2f5   :  { %577 = vsyncpa [#allocation5], 1 }
 0x2f6   :  { %579 = vsyncpa [#allocation5 + $0x1], 1 }
 0x2f7   :  { %580 = vsyncpa [#allocation6], 1 }
 0x2f8   :  { %582 = vsyncpa [#allocation6 + $0x1], 1 }

</bundles_post_ra>
